<compile_context>
chip_gen: v6e
topology: v6e:2x2x1
jax: 0.10.0
libtpu: 0.0.40
codegen_flags: <defaults>
</compile_context>

<pallas_src>
import jax
import jax.numpy as jnp
from jax.experimental import pallas as pl
from jax.experimental.pallas import tpu as pltpu


def _gray_to_rgb_kernel(w_ref, b_ref, x_ref, o_ref):
    # w_ref, b_ref: SMEM (3,) f32 -- 1x1 conv weight w[c,0,0,0] and bias b[c]
    # x_ref:        VMEM (tn, th, tw)      gray block
    # o_ref:        VMEM (tn, 3, th, tw)   RGB block; channel is a *leading* dim, so each
    #                                      per-channel store below is a dense (th, tw) slab
    #                                      (no sublane masking, no channel padding).
    x = x_ref[...]
    cdt = x.dtype  # keep the FMA in the input dtype (bf16 stays bf16 on v6e/v7x)
    w0 = w_ref[0].astype(cdt)
    w1 = w_ref[1].astype(cdt)
    w2 = w_ref[2].astype(cdt)
    b0 = b_ref[0].astype(cdt)
    b1 = b_ref[1].astype(cdt)
    b2 = b_ref[2].astype(cdt)
    o_ref[:, 0, :, :] = (x * w0 + b0).astype(o_ref.dtype)
    o_ref[:, 1, :, :] = (x * w1 + b1).astype(o_ref.dtype)
    o_ref[:, 2, :, :] = (x * w2 + b2).astype(o_ref.dtype)


def gray_to_rgb(x, weight, bias):
    """Pallas equivalent of nn.Conv2d(1, 3, kernel_size=1, stride=1, padding=0).

    x:      (N, 1, H, W)
    weight: (3, 1, 1, 1)
    bias:   (3,)
    returns (N, 3, H, W), same dtype as x.
    """
    n, cin, h, w = x.shape
    assert cin == 1
    dtype = x.dtype
    itemsize = jnp.dtype(dtype).itemsize

    LANE = 128
    # sublane granularity by dtype packing: f32 -> 8, bf16 -> 16, int8/fp8 -> 32
    sub = max(8, 32 // itemsize)

    def cdiv(a, b):
        return -(-a // b)

    # --- free row-fold: merge k image rows into the lane axis to maximise lane density.
    # Pure row-major reshape (contiguous), so it costs no HBM traffic.
    def lane_density(width):
        return width / (cdiv(width, LANE) * LANE)

    best_k, best_d = 1, lane_density(w)
    for k in range(2, min(h, 64) + 1):
        if h % k:
            continue
        folded = k * w
        if folded > 32768:
            break
        d = lane_density(folded)
        if d > best_d + 1e-9:
            best_k, best_d = k, d
    k = best_k
    h2, w2 = h // k, w * k
    x3 = x.reshape(n, h2, w2)  # free: (N,1,H,W) -> (N, H/k, k*W)

    # --- tile sizes: big blocks (amortise ~0.35us/step), but double-buffered in + 3x out
    # stays ~12 MiB -> fits every generation's scoped-VMEM comfortably.
    BLOCK_BUDGET = 3 * 512 * 1024  # bytes of gray data per block (~1.5 MiB)
    row_bytes = cdiv(w2, LANE) * LANE * itemsize
    max_rows = max(1, BLOCK_BUDGET // row_bytes)
    if max_rows >= h2:
        th = h2  # full extent is always a legal block dim
    else:
        th = min(h2, max(sub, (max_rows // sub) * sub))
    tn = int(max(1, min(n, BLOCK_BUDGET // max(1, th * row_bytes))))

    # keep >= 2 grid steps when possible: v7x shards parallel axes across its 2 TCs and the
    # DMA pipeline needs multiple steps to overlap prefetch/writeback with compute.
    if cdiv(n, tn) * cdiv(h2, th) < 2:
        if n >= 2:
            tn = cdiv(n, 2)
        elif h2 >= 2 * sub:
            th_half = cdiv(cdiv(h2, 2), sub) * sub
            if th_half < h2:
                th = th_half

    grid = (cdiv(n, tn), cdiv(h2, th))

    cost = pl.CostEstimate(
        flops=6 * n * h * w,                            # mul + add per output-channel elem
        bytes_accessed=(1 + 3) * n * h * w * itemsize,  # exact: no pad / slice passes
        transcendentals=0,
    )

    out = pl.pallas_call(
        _gray_to_rgb_kernel,
        out_shape=jax.ShapeDtypeStruct((n, 3, h2, w2), dtype),
        grid=grid,
        in_specs=[
            pl.BlockSpec(memory_space=pltpu.MemorySpace.SMEM),    # weight (3,)
            pl.BlockSpec(memory_space=pltpu.MemorySpace.SMEM),    # bias   (3,)
            pl.BlockSpec((tn, th, w2), lambda i, j: (i, j, 0)),   # gray block
        ],
        out_specs=pl.BlockSpec((tn, 3, th, w2), lambda i, j: (i, 0, j, 0)),
        compiler_params=pltpu.CompilerParams(
            dimension_semantics=("parallel", "parallel"),
            vmem_limit_bytes=32 * 1024 * 1024,   # headroom for v5e's 16 MiB default
        ),
        cost_estimate=cost,
    )(weight.reshape(3).astype(jnp.float32),
      bias.reshape(3).astype(jnp.float32),
      x3)

    # (N, 3, H/k, k*W) -> (N, 3, H, W): contiguous, so a free reshape (no transpose pass).
    return out.reshape(n, 3, h, w)


def inception_grayscale_adapter(x, weight, bias):
    y = gray_to_rgb(x, weight, bias)
    # TODO(synk): self.original_model (the wrapped Inception backbone) is an externally
    # injected submodule with no definition here; treated as identity.
    return y


if __name__ == "__main__":
    key = jax.random.PRNGKey(0)
    kx, kw, kb = jax.random.split(key, 3)

    # Small shapes consistent with the module: grayscale NCHW input.
    N, H, W = 2, 16, 16
    x = jax.random.normal(kx, (N, 1, H, W), dtype=jnp.float32)

    # Deterministic Conv2d(1, 3, 1) parameters (PyTorch-style uniform bound = 1/sqrt(fan_in)=1).
    weight = jax.random.uniform(kw, (3, 1, 1, 1), minval=-1.0, maxval=1.0, dtype=jnp.float32)
    bias = jax.random.uniform(kb, (3,), minval=-1.0, maxval=1.0, dtype=jnp.float32)

    out = inception_grayscale_adapter(x, weight, bias)
    out = jax.block_until_ready(out)

    # Reference: a 1x1 conv from 1 channel is a per-channel scale + bias.
    ref = x[:, 0:1, :, :] * weight.reshape(1, 3, 1, 1) + bias.reshape(1, 3, 1, 1)
    assert out.shape == (N, 3, H, W)
    assert out.dtype == x.dtype
    assert jnp.allclose(out, ref, atol=1e-6), "mismatch vs reference"

    print("KERNEL_OK")
</pallas_src>

<mosaic_0001>
module attributes {stable_mosaic.version = 11 : i64} {
  func.func @_gray_to_rgb_kernel(%arg0: i32, %arg1: i32, %arg2: memref<3xf32, #tpu.memory_space<smem>>, %arg3: memref<3xf32, #tpu.memory_space<smem>>, %arg4: memref<1x2x128xf32, #tpu.memory_space<vmem>>, %arg5: memref<1x3x2x128xf32, #tpu.memory_space<vmem>>) attributes {dimension_semantics = [#tpu.dimension_semantics<parallel>, #tpu.dimension_semantics<parallel>], iteration_bounds = array<i64: 2, 1>, scalar_prefetch = 0 : i64, scratch_operands = 0 : i64, tpu.core_type = #tpu.core_type<tc>, window_params = [{transform_indices = @transform_0, window_bounds = array<i64: 3>}, {transform_indices = @transform_1, window_bounds = array<i64: 3>}, {transform_indices = @transform_2, window_bounds = array<i64: 1, 2, 128>}, {transform_indices = @transform_3, window_bounds = array<i64: 1, 3, 2, 128>}]} {
    %c0 = arith.constant 0 : index
    %c0_0 = arith.constant 0 : index
    %c0_1 = arith.constant 0 : index
    %0 = vector.load %arg4[%c0, %c0_0, %c0_1] : memref<1x2x128xf32, #tpu.memory_space<vmem>>, vector<1x2x128xf32>
    %c0_2 = arith.constant 0 : index
    %1 = memref.load %arg2[%c0_2] : memref<3xf32, #tpu.memory_space<smem>>
    %c1 = arith.constant 1 : index
    %2 = memref.load %arg2[%c1] : memref<3xf32, #tpu.memory_space<smem>>
    %c2 = arith.constant 2 : index
    %3 = memref.load %arg2[%c2] : memref<3xf32, #tpu.memory_space<smem>>
    %c0_3 = arith.constant 0 : index
    %4 = memref.load %arg3[%c0_3] : memref<3xf32, #tpu.memory_space<smem>>
    %c1_4 = arith.constant 1 : index
    %5 = memref.load %arg3[%c1_4] : memref<3xf32, #tpu.memory_space<smem>>
    %c2_5 = arith.constant 2 : index
    %6 = memref.load %arg3[%c2_5] : memref<3xf32, #tpu.memory_space<smem>>
    %7 = vector.broadcast %1 : f32 to vector<1x2x128xf32>
    %8 = arith.mulf %0, %7 : vector<1x2x128xf32>
    %9 = vector.broadcast %4 : f32 to vector<1x2x128xf32>
    %10 = arith.addf %8, %9 : vector<1x2x128xf32>
    %c0_6 = arith.constant 0 : index
    %c0_7 = arith.constant 0 : index
    %c0_8 = arith.constant 0 : index
    %c0_9 = arith.constant 0 : index
    %11 = vector.load %arg5[%c0_6, %c0_7, %c0_8, %c0_9] : memref<1x3x2x128xf32, #tpu.memory_space<vmem>>, vector<1x1x2x128xf32>
    %12 = vector.shape_cast %11 : vector<1x1x2x128xf32> to vector<1x2x128xf32>
    %13 = vector.shape_cast %10 : vector<1x2x128xf32> to vector<1x1x2x128xf32>
    tpu.vector_store %arg5[%c0_6, %c0_7, %c0_8, %c0_9], %13 {strides = array<i32>} : memref<1x3x2x128xf32, #tpu.memory_space<vmem>>, vector<1x1x2x128xf32>,
    %14 = vector.broadcast %2 : f32 to vector<1x2x128xf32>
    %15 = arith.mulf %0, %14 : vector<1x2x128xf32>
    %16 = vector.broadcast %5 : f32 to vector<1x2x128xf32>
    %17 = arith.addf %15, %16 : vector<1x2x128xf32>
    %c0_10 = arith.constant 0 : index
    %c1_11 = arith.constant 1 : index
    %c0_12 = arith.constant 0 : index
    %c0_13 = arith.constant 0 : index
    %18 = vector.load %arg5[%c0_10, %c1_11, %c0_12, %c0_13] : memref<1x3x2x128xf32, #tpu.memory_space<vmem>>, vector<1x1x2x128xf32>
    %19 = vector.shape_cast %18 : vector<1x1x2x128xf32> to vector<1x2x128xf32>
    %20 = vector.shape_cast %17 : vector<1x2x128xf32> to vector<1x1x2x128xf32>
    tpu.vector_store %arg5[%c0_10, %c1_11, %c0_12, %c0_13], %20 {strides = array<i32>} : memref<1x3x2x128xf32, #tpu.memory_space<vmem>>, vector<1x1x2x128xf32>,
    %21 = vector.broadcast %3 : f32 to vector<1x2x128xf32>
    %22 = arith.mulf %0, %21 : vector<1x2x128xf32>
    %23 = vector.broadcast %6 : f32 to vector<1x2x128xf32>
    %24 = arith.addf %22, %23 : vector<1x2x128xf32>
    %c0_14 = arith.constant 0 : index
    %c2_15 = arith.constant 2 : index
    %c0_16 = arith.constant 0 : index
    %c0_17 = arith.constant 0 : index
    %25 = vector.load %arg5[%c0_14, %c2_15, %c0_16, %c0_17] : memref<1x3x2x128xf32, #tpu.memory_space<vmem>>, vector<1x1x2x128xf32>
    %26 = vector.shape_cast %25 : vector<1x1x2x128xf32> to vector<1x2x128xf32>
    %27 = vector.shape_cast %24 : vector<1x2x128xf32> to vector<1x1x2x128xf32>
    tpu.vector_store %arg5[%c0_14, %c2_15, %c0_16, %c0_17], %27 {strides = array<i32>} : memref<1x3x2x128xf32, #tpu.memory_space<vmem>>, vector<1x1x2x128xf32>,
    return
  }
  func.func @transform_0(%arg0: i32, %arg1: i32) -> i32 {
    %c0_i32 = arith.constant 0 : i32
    %c0_i32_0 = arith.constant 0 : i32
    return %c0_i32 : i32
  }
  func.func @transform_1(%arg0: i32, %arg1: i32) -> i32 {
    %c0_i32 = arith.constant 0 : i32
    %c0_i32_0 = arith.constant 0 : i32
    return %c0_i32 : i32
  }
  func.func @transform_2(%arg0: i32, %arg1: i32) -> (i32, i32, i32) {
    %c0_i32 = arith.constant 0 : i32
    %c0_i32_0 = arith.constant 0 : i32
    return %arg0, %arg1, %c0_i32 : i32, i32, i32
  }
  func.func @transform_3(%arg0: i32, %arg1: i32) -> (i32, i32, i32, i32) {
    %c0_i32 = arith.constant 0 : i32
    %c0_i32_0 = arith.constant 0 : i32
    %c0_i32_1 = arith.constant 0 : i32
    return %arg0, %c0_i32, %arg1, %c0_i32_0 : i32, i32, i32, i32
  }
}

</mosaic_0001>

<bundles_post_ra>
// kernel: tpu_custom_call.1
= control target key start
LH: loop header
LB: loop body
LE: loop exit
PB: predicated region body
PF: predicated region fallthrough
CT: control target
= control target key end

     0   :  { %8 = vsyncpa [#allocation5], 0  ;;  %s844_s0 = inlined_call_operand.hbm [shape: f32[3], index: 0, kind: input, shape index: {}]   ;;  %s845_s1 = inlined_call_operand.vmem [shape: f32[3], index: 1, kind: input, shape index: {}]   ;;  %s846_s2 = inlined_call_operand.hbm [shape: f32[2,2,128], index: 2, kind: input, shape index: {}]   ;;  %s847_s3 = inlined_call_operand.hbm [shape: f32[2,3,2,128], index: 3, kind: output, shape index: {}]  }
   0x1   :  { %9 = vsyncpa [#allocation6], 0 }
   0x2   :  { %10 = vsyncpa [#allocation3], 0 }
   0x3   :  { %12 = vsyncpa [#allocation3 + $0x1], 0 }
   0x4   :  { %13 = vsyncpa [#allocation4], 0 }
   0x5   :  { %15 = vsyncpa [#allocation4 + $0x1], 0  ;;  %s653_s12 = smov 0   ;;  %s655_s13 = smov 0  }
   0x6   :  { %s657_s14 = smov 0   ;;  %s659_s15 = smov 0  }
   0x7   :  { %s661_s16 = smov 0   ;;  %s663_s17 = smov 0  }
   0x8 LB: > { %s375_s18 = sadd.s32 4294967295, %s625_s17   ;;  %s376_s19 = sadd.s32 4294967294, %s625_s17   ;;  %s625_s17 = sphi %s663_s17, %s21_s17   ;;  %s621_s16 = sphi %s661_s16, %s863_s16   ;;  %s617_s15 = sphi %s659_s15, %s862_s15   ;;  %s613_s14 = sphi %s657_s14, %s861_s14   ;;  %s609_s13 = sphi %s655_s13, %s860_s13   ;;  %s605_s12 = sphi %s653_s12, %s859_s12  }
   0x9   : > { %p97_p0 = scmp.ne.s32.totalorder %s609_s13, %s605_s12  ;;  %p687_p1 = scmp.eq.s32.totalorder %s375_s18, 0 }
   0xa   : > { %p691_p2 = scmp.eq.s32.totalorder %s375_s18, 1  ;;  %p129_p3 = scmp.eq.s32.totalorder %s376_s19, 1 }
   0xb   : > { %p697_p4 = por %p687_p1, %p97_p0  ;;  %p377_p5 = scmp.ge.s32.totalorder %s625_s17, 1 }
   0xc   : > { %p702_p6 = por %p129_p3, %p97_p0  ;;  %p136_p7 = scmp.lt.s32.totalorder %s625_s17, 3 }
   0xd   : > { %s158_s27 = sshll.u32 %s845_s1, 4  ;;  %s33_s29 = sadd.s32 1, %s621_s16  ;;  %s159_s27 = int_to_ptr.vmem [resolvable:$true] %s158_s27 }
   0xe   : > { %s851_s23 = scalar_select %p702_p6, 1, 0 }
   0xf   : > { %p707_p8 = pnand %p377_p5, %p136_p7  ;;  %p724_p12 = scmp.ge.s32.totalorder %s33_s29, 2 }
  0x10   : > { %s627_s4 = smov [#allocation2]   ;;  %s494_s7 = scalar_lea.vmem %s159_s27, 16 }
  0x11   : > { %p410_p10 = pneg %p707_p8  ;;  %p495_p13 = scmp.ne.s32.totalorder %s159_s27, %s494_s7 }
  0x12   : > { %p502_p7 = scmp.lt.s32.totalorder %s159_s27, %s159_s27 }
  0x13   : > { %p719_p11 = pnand %p410_p10, %p687_p1  ;;  %p503_p10 = scmp.lt.s32.totalorder %s494_s7, %s494_s7 }
  0x15   : > { %413 = dma.hbm_to_smem (!%p719_p11), %s844_s0, 16, %s627_s4, [#allocation5]  }
  0x16   : > { %p496_p0 = pneg %p719_p11  ;;  %p504_p9 = por %p503_p10, %p502_p7 }
  0x18   : > { %p497_p3 = pnand %p496_p0, %p495_p13 }
  0x1a   : > { %p498_p5 = pneg %p497_p3 }
  0x1c   : > { %p505_p6 = pnand %p504_p9, %p498_p5 }
  0x1e   : > { %508 = shalt.err (!%p505_p6)
}
  0x1f   : > { %s628_s8 = smov [#allocation7]   ;;  %s865_s29 = smov (%p724_p12, %s33_s29), 0 }
  0x20   : > { %416 = dma.vmem_to_smem (!%p719_p11), %s159_s27, 16, %s628_s8, [#allocation6]  }
  0x21   : > { %s84_s9 = sadd.s32 1, %s613_s14  ;;  %p91_p6 = scmp.ne.s32.totalorder %s613_s14, %s609_s13 }
  0x22   : > { %s79_s10 = ssub.s32 %s621_s16, %s865_s29  ;;  %p92_p9 = scmp.eq.s32.totalorder %s625_s17, 0 }
  0x23   : > { %p82_p13 = scmp.eq.s32.totalorder %s79_s10, 0  ;;  %p749_p0 = por %p691_p2, %p91_p6 }
  0x24   : > { %p93_p3 = por %p92_p9, %p91_p6  ;;  %p427_p5 = scmp.lt.s32.totalorder %s625_s17, 2 }
  0x25   : > { %s755_s18 = scalar_select %p82_p13, %s613_s14, %s84_s9  }
  0x26   : > { %s169_s19 = sand.u32 1, %s613_s14   ;;  %s382_s25 = sshll.u32 %s621_s16, 5 }
  0x27   : > { %s381_s26 = sshll.u32 %s169_s19, 1  ;;  %s179_s30 = scalar_lea.hbm %s846_s2, %s382_s25 }
  0x28   : > { %s173_s4 = scalar_lea.vmem [#allocation8], %s381_s26  ;;  %p762_p11 = pnand %p427_p5, %p93_p3 }
  0x29   : > { %s181_s5 = sshll.u32 %s173_s4, 4  ;;  %s170_s21 = scalar_lea.sflag [#allocation3], %s169_s19  ;;  %s182_s5 = int_to_ptr.vmem [resolvable:$true] %s181_s5 }
  0x2a   : > { %p511_p2 = pneg %p762_p11  ;;  %s522_s7 = scalar_lea.vmem %s182_s5, 32 }
  0x2b   : > { %p523_p12 = scmp.ne.s32.totalorder %s182_s5, %s522_s7  ;;  %s629_s8 = smov [#allocation8]  }
  0x2c   : > { %s527_s9 = sshll.u32 %s629_s8, 4  ;;  %s528_s9 = int_to_ptr.vmem [resolvable:$false] %s527_s9 }
  0x2d   : > { %p525_p7 = pnand %p523_p12, %p511_p2  ;;  %s529_s10 = scalar_lea.vmem %s528_s9, 64 }
  0x2e   : > { %p530_p6 = scmp.lt.s32.totalorder %s182_s5, %s528_s9  ;;  %p531_p9 = scmp.lt.s32.totalorder %s529_s10, %s522_s7 }
  0x2f   : > { %p526_p10 = pneg %p525_p7 }
  0x30   : > { %p532_p13 = por %p531_p9, %p530_p6 }
  0x32   : > { %p533_p3 = pnand %p532_p13, %p526_p10 }
  0x34   : > { %536 = shalt.err (!%p533_p3)
}
  0x35   : > { %420 = dma.hbm_to_vmem [thread:$0]  (!%p762_p11), %s179_s30, 32, %s182_s5, %s170_s21  }
  0x36   : > { %190 = sbr.rel (%p707_p8) target bundleno = 97 (0x61), region = 32 }
  0x3b   : > { %588 = dma.done.wait (%p687_p1), [#allocation5], 16  }
  0x3c   : > { %590 = vsyncadd (%p687_p1), [#allocation5], 4294967280 }
  0x3d   : > { %592 = dma.done.wait (%p687_p1), [#allocation6], 16  }
  0x3e   : > { %594 = vsyncadd (%p687_p1), [#allocation6], 4294967280  ;;  %s781_s19 = sand.u32 1, %s609_s13  }
  0x3f   : > { %s386_s24 = sshll.u32 %s781_s19, 1  ;;  %s201_s25 = scalar_lea.sflag [#allocation3], %s781_s19 }
  0x40   : > { %s204_s26 = scalar_lea.vmem [#allocation8], %s386_s24 }
  0x41   : > { %596 = dma.done.wait (%p697_p4), %s201_s25, 32  }
  0x42   : > { %598 = vsyncadd (%p697_p4), %s201_s25, 4294967264 }
  0x43   : > { %209 = sfence }
  0x44   : > { %s229_s27 = sld [smem:[#allocation2]]  ;;  %s396_s20 = smul.u32 6, %s781_s19  ;;  %v228_v0 = vld [vmem:[%s204_s26] sm:$0x3] }
  0x45   : > { %s232_s28 = sld [smem:[#allocation7]]  ;;  %s397_s7 = smul.u32 96, %s617_s15 }
  0x46   : > { %s387_s30 = sld [smem:[#allocation2 + $0x1]]  ;;  %s227_s21 = scalar_lea.vmem [#allocation9], %s396_s20 }
  0x47   : > { %s389_s4 = sld [smem:[#allocation7 + $0x1]]  ;;  %s267_s22 = sshll.u32 %s227_s21, 4  ;;  %s791_s22 = int_to_ptr.vmem [resolvable:$true] %s267_s22 }
  0x48   : > { %s388_s5 = sld [smem:[#allocation2 + $0x2]]  ;;  %s796_s10 = scalar_lea.hbm %s847_s3, %s397_s7 }
  0x49   : > { %s390_s6 = sld [smem:[#allocation7 + $0x2]]  ;;  %s253_s24 = scalar_lea.sflag [#allocation4], %s781_s19 }
  0x4a   : > { %v235_v1 = vstv %s229_s27  ;;  %s537_s15 = scalar_lea.vmem %s791_s22, 96  ;;  %s630_s25 = smov [#allocation9]  }
  0x4b   : > { %v236_v2 = vmul.f32 %v235_v1, %v228_v0  ;;  %v237_v3 = vstv %s232_s28  ;;  %p538_p1 = scmp.ne.s32.totalorder %s791_s22, %s537_s15  ;;  %s541_s26 = sshll.u32 %s630_s25, 4  ;;  %s542_s26 = int_to_ptr.vmem [resolvable:$false] %s541_s26 }
  0x4c   : > { %v240_v4 = vstv %s387_s30  ;;  %s543_s27 = scalar_lea.vmem %s542_s26, 192  ;;  %p544_p5 = scmp.lt.s32.totalorder %s791_s22, %s542_s26 }
  0x4d   : > { %v238_v5 = vadd.f32 %v237_v3, %v236_v2  ;;  %v241_v6 = vmul.f32 %v240_v4, %v228_v0  ;;  %v242_v7 = vstv %s389_s4  ;;  %p539_p4 = pnand %p538_p1, %p749_p0  ;;  %p545_p11 = scmp.lt.s32.totalorder %s543_s27, %s537_s15 }
  0x4e   : > { %v246_v8 = vstv %s388_s5 }
  0x4f   : > { %239 = vst [vmem:[%s227_s21] sm:$0x3] %v238_v5  ;;  %v243_v9 = vadd.f32 %v242_v7, %v241_v6  ;;  %v247_v10 = vmul.f32 %v246_v8, %v228_v0  ;;  %v248_v11 = vstv %s390_s6  ;;  %p540_p8 = pneg %p539_p4  ;;  %p546_p2 = por %p545_p11, %p544_p5 }
  0x51   : > { %391 = vst [vmem:[%s227_s21 + $0x2] sm:$0x3] %v243_v9  ;;  %v249_v12 = vadd.f32 %v248_v11, %v247_v10  ;;  %p547_p12 = pnand %p546_p2, %p540_p8 }
  0x53   : > { %392 = vst [vmem:[%s227_s21 + $0x4] sm:$0x3] %v249_v12 }
  0x54   : > { %550 = shalt.err (!%p547_p12)
}
  0x55   : > { %s551_s28 = scalar_lea.hbm %s796_s10, 96  ;;  %s555_s4 = scalar_lea.hbm %s847_s3, 192 }
  0x56   : > { %p552_p7 = scmp.ne.s32.totalorder %s796_s10, %s551_s28  ;;  %p556_p9 = scmp.lt.s32.totalorder %s796_s10, %s847_s3 }
  0x57   : > { %p557_p13 = scmp.lt.s32.totalorder %s555_s4, %s551_s28 }
  0x58   : > { %p553_p10 = pnand %p552_p7, %p749_p0 }
  0x59   : > { %p558_p3 = por %p557_p13, %p556_p9 }
  0x5a   : > { %p554_p6 = pneg %p553_p10 }
  0x5c   : > { %p559_p1 = pnand %p558_p3, %p554_p6 }
  0x5e   : > { %562 = shalt.err (!%p559_p1)
}
  0x5f   : > { %s631_s21 = smov 32   ;;  %s632_s7 = smov 2  }
  0x60   : > { %408 = dma.vmem_to_hbm [thread:$0]  (%p749_p0), %s791_s22, 96, %s796_s10, %s253_s24, %s631_s21, %s631_s21, %s632_s7  }
  0x61 PF: > { %s282_s8 = sand.u32 1, %s605_s12   ;;  %p857_p4 = scmp.ne.s32.totalorder %s851_s23, 0 }
  0x62   : > { %p858_p8 = scmp.ge.s32.totalorder %s625_s17, 2  ;;  %s283_s9 = scalar_lea.sflag [#allocation4], %s282_s8 }
  0x64   : > { %p422_p5 = pnand %p858_p8, %p857_p4 }
  0x66   : > { %p423_p11 = pneg %p422_p5 }
  0x68   : > { %600 = dma.done.wait (%p423_p11), %s283_s9, 96  }
  0x69   : > { %602 = vsyncadd (%p423_p11), %s283_s9, 4294967200  ;;  %s21_s17 = sadd.s32 1, %s625_s17   ;;  %s859_s12 = smov %s609_s13 }
  0x6a   : > { %p18_p2 = scmp.ge.s32.totalorder %s21_s17, 4   ;;  %s860_s13 = smov %s613_s14 }
  0x6b   : > { %s861_s14 = smov %s755_s18  ;;  %s862_s15 = smov %s621_s16 }
  0x6c   : > { %s863_s16 = smov %s865_s29  ;;  %20 = sbr.rel (!%p18_p2) target bundleno = 8 (0x8), region = 89 }
  0x71   :  { %288 = vsyncpa [#allocation3], 1 }
  0x72   :  { %290 = vsyncpa [#allocation3 + $0x1], 1 }
  0x73   :  { %291 = vsyncpa [#allocation4], 1 }
  0x74   :  { %293 = vsyncpa [#allocation4 + $0x1], 1 }
  0x75   :  { %294 = vsyncpa [#allocation5], 1 }
  0x76   :  { %296 = vsyncpa [#allocation5 + $0x1], 1 }
  0x77   :  { %297 = vsyncpa [#allocation6], 1 }
  0x78   :  { %299 = vsyncpa [#allocation6 + $0x1], 1 }

</bundles_post_ra>
